<compile_context>
chip_gen: v7x
topology: tpu7x:2x2x1
jax: 0.10.0
libtpu: 0.0.40
codegen_flags: <defaults>
</compile_context>

<pallas_src>
import functools

import jax
import jax.numpy as jnp
from jax.experimental import pallas as pl
from jax.experimental.pallas import tpu as pltpu


def _round_up(x, m):
    return (x + m - 1) // m * m


# ----------------------------------------------------------------------------
# Kernel 1: column-wise standardization  x = (x - mean_0) / std_0 (unbiased)
# ----------------------------------------------------------------------------
def standardize_kernel(x_ref, o_ref):
    x = x_ref[...].astype(jnp.float32)
    n = x.shape[0]
    mean = jnp.sum(x, axis=0, keepdims=True) * (1.0 / n)
    d = x - mean
    var = jnp.sum(d * d, axis=0, keepdims=True) * (1.0 / max(n - 1, 1))
    # EUP rsqrt instead of / sqrt(); eps guards constant feature columns.
    o_ref[...] = d * jax.lax.rsqrt(jnp.maximum(var, 1e-12))


def standardize(x):
    return pl.pallas_call(
        standardize_kernel,
        out_shape=jax.ShapeDtypeStruct(x.shape, jnp.float32),
    )(x)


# ----------------------------------------------------------------------------
# Kernel 2: fused per-run-block GNN stack + edge-score MLP
# ----------------------------------------------------------------------------
def psagnn_kernel(keepnf_ref, keepfn_ref, xs_ref, xst_ref, ahat_ref, smt_ref,
                  w1_ref, b1_ref, wg_ref, acat_ref, bg_ref, w2_ref, b2_ref,
                  wm1b_ref, bm1b_ref, wm2b_ref, bm2_ref,
                  out_ref, score_ref,
                  h_scr, hw_scr, a_scr,
                  *, hidlayers, num_edges, runs_per_step, exp_dtype):
    f32 = jnp.float32
    bf16 = jnp.bfloat16
    RB = runs_per_step
    N = ahat_ref.shape[0]
    F = xs_ref.shape[1]
    H = w1_ref.shape[1]
    L = w2_ref.shape[1]
    E_pad = smt_ref.shape[1]

    ahat = ahat_ref[...]                     # (N, N) bf16
    nb = ahat > 0                            # neighbour mask (self loops included)

    # ---- lane-batching relayout: (RB*N, C) <-> (N, RB*C) ---------------------
    # This implements the review's "single (N,N)x(N,RB*C) dot" batching; the
    # relayout itself uses only static slices + concatenate (data movement,
    # no matmuls) so it lowers robustly.
    def to_lane_batched(t):
        if RB == 1:
            return t
        return jnp.concatenate([t[r * N:(r + 1) * N, :] for r in range(RB)], axis=1)

    def from_lane_batched(t, c):
        if RB == 1:
            return t
        return jnp.concatenate([t[:, r * c:(r + 1) * c] for r in range(RB)], axis=0)

    def gcn_aggregate(t):
        # One wide MXU call aggregates all RB runs at once (shared A_hat).
        c = t.shape[1]
        tl = to_lane_batched(t).astype(bf16)                     # (N, RB*c)
        ag = jnp.dot(ahat, tl, preferred_element_type=f32)       # (N, RB*c)
        return from_lane_batched(ag, c)                          # (RB*N, c)

    # ---- per-run node features from the shared standardized features --------
    keep_nf = keepnf_ref[...]                                    # (RB, N, 1) bf16
    xf = (xs_ref[...][None, :, :] * keep_nf).reshape(RB * N, F)  # (RB*N, F) bf16

    # ---- GCN1: shared-weight transform batched, aggregation lane-batched ----
    t1 = jnp.dot(xf, w1_ref[...], preferred_element_type=f32)    # (RB*N, H)
    h_scr[...] = jnp.maximum(gcn_aggregate(t1) + b1_ref[...], 0.0)
    # TODO(synk): nn.Dropout is stochastic; identity here (eval semantics).

    # ---- hidlayers x GAT (heads=1, LeakyReLU 0.2, self loops via nb) --------
    wg = wg_ref[...]
    acat = acat_ref[...]                                         # (H, 2) = [a_src|a_dst]
    bgb = jnp.broadcast_to(bg_ref[...], (N, H))                  # hoisted bias broadcast
    for _ in range(hidlayers):
        hw = jnp.dot(h_scr[...].astype(bf16), wg, preferred_element_type=f32)
        hwb = hw.astype(bf16)
        hw_scr[...] = hwb
        # a_src / a_dst for all runs in one fused matmul.
        a_scr[...] = jnp.dot(hwb, acat, preferred_element_type=f32)   # (RB*N, 2)

        def run_body(r, carry):
            # Per-run attention is inherently per-run (mask/softmax differ);
            # fori_loop + scratch slices bound the live ranges.
            base = pl.multiple_of(r * N, N)
            hw_r = hw_scr[pl.ds(base, N), :]                    # (N, H) bf16
            a_r = a_scr[pl.ds(base, N), :]                      # (N, 2) f32
            a_dst = a_r[:, 1:2]                                 # (N, 1)
            a_src = a_r[:, 0:1].reshape(1, N)                   # (1, N)
            e = a_dst + a_src                                   # e[i,j]=a_dst[i]+a_src[j]
            e = jnp.where(e >= 0, e, 0.2 * e)                   # LeakyReLU(0.2)
            e = jnp.where(nb, e, -1e30)                         # neighbours only
            e = e - jnp.max(e, axis=1, keepdims=True)
            # masked entries -> exp == 0, so no extra mask multiply is needed;
            # bf16 exp on v6e/v7x (bf16 EUP), f32 elsewhere.
            w = jnp.exp(e.astype(exp_dtype)).astype(f32)
            # approx reciprocal: rows sum to 1 only up to ~2^-12 (documented).
            att = w * pl.reciprocal(jnp.sum(w, axis=1, keepdims=True), approx=True)
            agg = jnp.dot(att.astype(bf16), hw_r, preferred_element_type=f32)
            h_scr[pl.ds(base, N), :] = jnp.maximum(agg + bgb, 0.0)
            return carry

        jax.lax.fori_loop(0, RB, run_body, 0)
        # TODO(synk): dropout identity (see above).

    # ---- GCN2 + log_softmax over labels (batched over runs, unpadded L) -----
    z0 = jnp.dot(h_scr[...].astype(bf16), w2_ref[...], preferred_element_type=f32)
    z = gcn_aggregate(z0) + b2_ref[...]                          # (RB*N, L)
    z = z - jnp.max(z, axis=1, keepdims=True)
    z = z - jnp.log(jnp.sum(jnp.exp(z), axis=1, keepdims=True))
    out_ref[...] = z.reshape(RB, N, L)

    # ---- edge-score MLP: runs x features on sublanes, edges on lanes --------
    keep_fn = keepfn_ref[...]                                    # (RB, 1, N) bf16
    xt = (xst_ref[...][None, :, :] * keep_fn).reshape(RB * F, N) # (RB*F, N) bf16
    erep = jnp.dot(xt, smt_ref[...], preferred_element_type=f32) # (RB*F, E_pad)
    # Block-diagonal (kron) MLP weights -> all runs in two matmuls, result is
    # already the dense (RB, E_pad) score tile.
    hm = jnp.dot(wm1b_ref[...], erep.astype(bf16),
                 preferred_element_type=f32) + bm1b_ref[...]     # (RB*2F, E_pad)
    hm = jnp.maximum(hm, 0.0)
    sc = jnp.dot(wm2b_ref[...], hm.astype(bf16),
                 preferred_element_type=f32) + bm2_ref[...]      # (RB, E_pad)
    valid = jax.lax.broadcasted_iota(jnp.int32, (RB, E_pad), 1) < num_edges
    emin = jnp.min(jnp.where(valid, sc, jnp.inf), axis=1, keepdims=True)
    emax = jnp.max(jnp.where(valid, sc, -jnp.inf), axis=1, keepdims=True)
    # eps guard: degenerate all-equal scores map to 0 instead of NaN.
    scn = (sc - emin) / jnp.maximum(emax - emin, 1e-12)
    score_ref[0] = jnp.where(valid, scn, 0.0)


def _exp_dtype_for_device():
    try:
        kind = jax.devices()[0].device_kind.lower()
    except Exception:
        kind = ""
    # bf16 EUP exists on v6e/v7x only; stay f32 on v5e/v5p/v4 and unknowns.
    return jnp.bfloat16 if ("v6" in kind or "v7" in kind) else jnp.float32


def _vmem_limit_bytes(block_bytes, scratch_bytes):
    try:
        cap = int(pltpu.get_tpu_info().vmem_capacity_bytes)
    except Exception:
        cap = 64 << 20                       # conservative (v7x per-core VMEM)
    # per-step footprint: pipelined blocks are double-buffered, plus scratch and
    # headroom for in-kernel intermediates / spills.
    need = 2 * block_bytes + scratch_bytes + (16 << 20)
    return int(max(8 << 20, min(need, (cap * 7) // 10)))


def _pick_runs_per_step(R, N, F, H, E_pad, budget_bytes=24 << 20):
    # Largest divisor of R that (a) leaves n_steps >= 2 (pipelining + v7x
    # 2-core split of the 'parallel' grid axis) and (b) keeps the per-step
    # working set (activations, kron edge-MLP weights, edge buffers) modest.
    best = 1
    for rb in range(1, R + 1):
        if R % rb:
            continue
        if R // rb < 2 and R > 1:
            continue
        per_step = (rb * N * (4 * F + 10 * H)        # features + h/hw/relayout buffers
                    + rb * rb * (2 * F * F + 2 * F) * 2   # kron edge-MLP weights
                    + rb * E_pad * 16                      # edge-MLP intermediates
                    + rb * 2 * F * E_pad * 4)
        if per_step <= budget_bytes:
            best = rb
    return best


def psagnn_forward(xs, drop, ahat, s_mat, params, *, hidlayers, runs_per_step=None):
    R, N = drop.shape
    F = xs.shape[1]
    E = s_mat.shape[0]
    H = params["W1"].shape[1]
    L = params["W2"].shape[1]
    E_pad = _round_up(E, 128)

    RB = (_pick_runs_per_step(R, N, F, H, E_pad)
          if runs_per_step is None else runs_per_step)
    assert R % RB == 0
    n_steps = R // RB

    bf16 = jnp.bfloat16
    f32 = jnp.float32

    # Features shipped once (tiny shared constants) + per-run keep masks in the
    # two layouts the kernel needs (avoids any in-kernel transpose).
    keep = (1.0 - drop.astype(f32))
    keep_nf = keep.reshape(R, N, 1).astype(bf16)
    keep_fn = keep.reshape(R, 1, N).astype(bf16)
    xs_b = xs.astype(bf16)
    xst_b = xs.T.astype(bf16)
    ahat_b = ahat.astype(bf16)
    smt = jnp.zeros((N, E_pad), f32).at[:, :E].set(s_mat.T).astype(bf16)

    eye = jnp.eye(RB, dtype=f32)
    w1 = params["W1"].astype(bf16)
    b1 = params["b1"].astype(f32)
    wg = params["Wg"].astype(bf16)
    acat = jnp.concatenate([params["a_src"], params["a_dst"]], axis=1).astype(bf16)
    bg = params["bg"].astype(f32)
    w2 = params["W2"].astype(bf16)
    b2 = params["b2"].astype(f32)
    # Block-diagonal edge-MLP weights (one per run block).  O(RB^2) in size,
    # which the run-block picker keeps small.
    wm1b = jnp.kron(eye, params["Wm1"].T).astype(bf16)    # (RB*2F, RB*F)
    bm1b = jnp.tile(params["bm1"].T, (RB, 1)).astype(f32) # (RB*2F, 1)
    wm2b = jnp.kron(eye, params["Wm2"].T).astype(bf16)    # (RB, RB*2F)
    bm2 = params["bm2"].astype(f32)                       # (1, 1)

    gridded = (keep_nf, keep_fn)
    consts = (xs_b, xst_b, ahat_b, smt, w1, b1, wg, acat, bg, w2, b2,
              wm1b, bm1b, wm2b, bm2)
    inputs = gridded + consts

    # Per-step block footprint -> VMEM limit (capped below physical VMEM).
    block_bytes = sum(int(a.size) * a.dtype.itemsize // n_steps for a in gridded)
    block_bytes += sum(int(a.size) * a.dtype.itemsize for a in consts)
    block_bytes += RB * N * L * 4 + RB * E_pad * 4
    scratch_bytes = RB * N * H * 4 + RB * N * H * 2 + RB * N * 2 * 4
    vmem_limit = _vmem_limit_bytes(block_bytes, scratch_bytes)

    kernel = functools.partial(
        psagnn_kernel, hidlayers=hidlayers, num_edges=E, runs_per_step=RB,
        exp_dtype=_exp_dtype_for_device())

    def cmap(shape):
        return pl.BlockSpec(shape, lambda g, _n=len(shape): (0,) * _n)

    out_logp, out_score = pl.pallas_call(
        kernel,
        out_shape=(
            jax.ShapeDtypeStruct((R, N, L), f32),
            jax.ShapeDtypeStruct((n_steps, RB, E_pad), f32),
        ),
        grid=(n_steps,),
        in_specs=[
            pl.BlockSpec((RB, N, 1), lambda g: (g, 0, 0)),   # keep mask (node major)
            pl.BlockSpec((RB, 1, N), lambda g: (g, 0, 0)),   # keep mask (feat major)
            cmap((N, F)), cmap((F, N)),                      # shared features
            cmap((N, N)), cmap((N, E_pad)),                  # A_hat, incidence^T
            cmap((F, H)), cmap((1, H)),                      # GCN1
            cmap((H, H)), cmap((H, 2)), cmap((1, H)),        # GAT
            cmap((H, L)), cmap((1, L)),                      # GCN2 (unpadded L)
            cmap((RB * 2 * F, RB * F)), cmap((RB * 2 * F, 1)),
            cmap((RB, RB * 2 * F)), cmap((1, 1)),            # kron edge MLP
        ],
        out_specs=(
            pl.BlockSpec((RB, N, L), lambda g: (g, 0, 0)),
            pl.BlockSpec((1, RB, E_pad), lambda g: (g, 0, 0)),
        ),
        scratch_shapes=[
            pltpu.VMEM((RB * N, H), f32),    # h (persistent, no concat)
            pltpu.VMEM((RB * N, H), bf16),   # hw (per GAT layer)
            pltpu.VMEM((RB * N, 2), f32),    # [a_src | a_dst]
        ],
        compiler_params=pltpu.CompilerParams(
            dimension_semantics=("parallel",),
            vmem_limit_bytes=vmem_limit),
    )(*inputs)

    scores = out_score.reshape(R, E_pad)[:, :E]
    return out_logp, scores


# ----------------------------------------------------------------------------
# Glue: graph -> dense operators, deterministic params, sampling
# ----------------------------------------------------------------------------
def build_graph_operators(edge_index, num_nodes):
    row, col = edge_index[0], edge_index[1]          # source, target (PyG)
    E = edge_index.shape[1]
    A = jnp.zeros((num_nodes, num_nodes), jnp.float32).at[col, row].add(1.0)
    A = A + jnp.eye(num_nodes, dtype=jnp.float32)    # add self loops
    deg = jnp.sum(A, axis=1)
    dinv = 1.0 / jnp.sqrt(deg)
    ahat = dinv[:, None] * A * dinv[None, :]         # D^-1/2 (A+I) D^-1/2
    s_mat = (jnp.zeros((E, num_nodes), jnp.float32)
             .at[jnp.arange(E), row].add(1.0)
             .at[jnp.arange(E), col].add(-1.0))      # edge_rep = x[row]-x[col]
    return ahat, s_mat


def init_params(key, num_feature, num_label, hiddim):
    ks = jax.random.split(key, 10)
    g = lambda k, shape, fan: (jax.random.normal(k, shape, jnp.float32)
                               / jnp.sqrt(jnp.float32(fan)))
    F, H, L = num_feature, hiddim, num_label
    return {
        "W1": g(ks[0], (F, H), F), "b1": jnp.zeros((1, H), jnp.float32),
        "Wg": g(ks[1], (H, H), H),
        "a_src": g(ks[2], (H, 1), H), "a_dst": g(ks[3], (H, 1), H),
        "bg": jnp.zeros((1, H), jnp.float32),
        "W2": g(ks[4], (H, L), H), "b2": jnp.zeros((1, L), jnp.float32),
        "Wm1": g(ks[5], (F, 2 * F), F), "bm1": jnp.zeros((1, 2 * F), jnp.float32),
        "Wm2": g(ks[6], (2 * F, 1), 2 * F), "bm2": jnp.zeros((1, 1), jnp.float32),
    }


def sample_edges_without_replacement(key, weights, k):
    # Gumbel top-k == multinomial without replacement, proportional to weights.
    # Degenerate all-zero weights fall back to (effectively) uniform first-k,
    # where torch.multinomial would raise -- documented deviation.
    u = jax.random.uniform(key, weights.shape, minval=1e-10, maxval=1.0)
    gumbel = -jnp.log(-jnp.log(u))
    logw = jnp.where(weights > 0, jnp.log(jnp.maximum(weights, 1e-30)), -jnp.inf)
    _, idx = jax.lax.top_k(logw + gumbel, k)
    return idx


if __name__ == "__main__":
    # --- sizes consistent with PSAGNNNet(num_feature, num_label, hiddim, ...) ---
    num_feature, num_label, hiddim, hidlayers = 8, 4, 32, 2
    N, num_runs, p = 16, 4, 0.5

    key = jax.random.PRNGKey(0)
    k_x, k_drop, k_par, k_samp = jax.random.split(key, 4)

    # node features (data.x)
    x = jax.random.normal(k_x, (N, num_feature), jnp.float32)

    # deterministic small graph: ring (both directions) + chords (both directions)
    src = jnp.arange(N, dtype=jnp.int32)
    dst = (src + 1) % N
    chord_src = jnp.arange(0, N, 2, dtype=jnp.int32)
    chord_dst = (chord_src + 5) % N
    edge_index = jnp.concatenate(
        [jnp.stack([src, dst]), jnp.stack([dst, src]),
         jnp.stack([chord_src, chord_dst]), jnp.stack([chord_dst, chord_src])],
        axis=1)
    E = edge_index.shape[1]
    n_reserve = int(p * E)

    # node-drop mask: bool (num_runs, N)
    drop = jax.random.bernoulli(k_drop, 0.1, (num_runs, N))

    params = init_params(k_par, num_feature, num_label, hiddim)
    ahat, s_mat = build_graph_operators(edge_index, N)

    # standardize features (Pallas kernel 1); node drop is folded into the main
    # kernel via the keep mask (features are shipped to HBM only once).
    # TODO(synk): as in the PyTorch code, node drop only zeroes features; edges
    # incident to dropped nodes stay in the per-run graph operators.
    xs = standardize(x)

    # fused GNN + edge-score kernel (Pallas kernel 2)
    logp, scores = psagnn_forward(xs, drop, ahat, s_mat, params,
                                  hidlayers=hidlayers)
    logp = jax.block_until_ready(logp)
    scores = jax.block_until_ready(scores)

    # per-run edge sampling (torch.multinomial w/o replacement -> Gumbel top-k)
    index_edge_drop = []
    samp_keys = jax.random.split(k_samp, num_runs)
    for i in range(num_runs):
        idx = sample_edges_without_replacement(samp_keys[i], scores[i], n_reserve)
        index_edge_drop.append(edge_index[:, idx])

    out = [logp[i] for i in range(num_runs)]          # list of (N, num_label) log-probs
    result = (drop, out, index_edge_drop)
    jax.block_until_ready(result[1][0])

    assert logp.shape == (num_runs, N, num_label)
    assert scores.shape == (num_runs, E)
    assert all(e.shape == (2, n_reserve) for e in index_edge_drop)
    assert bool(jnp.all(jnp.isfinite(logp))) and bool(jnp.all(jnp.isfinite(scores)))
    print("KERNEL_OK")
</pallas_src>

<mosaic_0001>
module attributes {stable_mosaic.version = 11 : i64} {
  func.func @standardize_kernel(%arg0: memref<16x8xf32, #tpu.memory_space<vmem>>, %arg1: memref<16x8xf32, #tpu.memory_space<vmem>>) attributes {dimension_semantics = [], scalar_prefetch = 0 : i64, scratch_operands = 0 : i64, tpu.core_type = #tpu.core_type<tc>} {
    %c0 = arith.constant 0 : index
    %c0_0 = arith.constant 0 : index
    %0 = vector.load %arg0[%c0, %c0_0] : memref<16x8xf32, #tpu.memory_space<vmem>>, vector<16x8xf32>
    %cst = arith.constant dense<0.000000e+00> : vector<8xf32>
    %1 = vector.multi_reduction <add>, %0, %cst [0] : vector<16x8xf32> to vector<8xf32>
    %2 = vector.shape_cast %1 : vector<8xf32> to vector<1x8xf32>
    %cst_1 = arith.constant 6.250000e-02 : f32
    %3 = vector.broadcast %cst_1 : f32 to vector<1x8xf32>
    %4 = arith.mulf %2, %3 : vector<1x8xf32>
    %5 = vector.broadcast %4 : vector<1x8xf32> to vector<16x8xf32>
    %6 = arith.subf %0, %5 : vector<16x8xf32>
    %7 = arith.mulf %6, %6 : vector<16x8xf32>
    %cst_2 = arith.constant dense<0.000000e+00> : vector<8xf32>
    %8 = vector.multi_reduction <add>, %7, %cst_2 [0] : vector<16x8xf32> to vector<8xf32>
    %9 = vector.shape_cast %8 : vector<8xf32> to vector<1x8xf32>
    %cst_3 = arith.constant 0.0666666701 : f32
    %10 = vector.broadcast %cst_3 : f32 to vector<1x8xf32>
    %11 = arith.mulf %9, %10 : vector<1x8xf32>
    %cst_4 = arith.constant 9.99999996E-13 : f32
    %12 = vector.broadcast %cst_4 : f32 to vector<1x8xf32>
    %13 = arith.maximumf %11, %12 : vector<1x8xf32>
    %14 = math.rsqrt %13 : vector<1x8xf32>
    %15 = vector.broadcast %14 : vector<1x8xf32> to vector<16x8xf32>
    %16 = arith.mulf %6, %15 : vector<16x8xf32>
    %c0_5 = arith.constant 0 : index
    %c0_6 = arith.constant 0 : index
    %17 = vector.load %arg1[%c0_5, %c0_6] : memref<16x8xf32, #tpu.memory_space<vmem>>, vector<16x8xf32>
    tpu.vector_store %arg1[%c0_5, %c0_6], %16 {strides = array<i32>} : memref<16x8xf32, #tpu.memory_space<vmem>>, vector<16x8xf32>,
    return
  }
}

</mosaic_0001>

<bundles_post_ra>
// kernel: tpu_custom_call.1
= control target key start
LH: loop header
LB: loop body
LE: loop exit
PB: predicated region body
PF: predicated region fallthrough
CT: control target
= control target key end

     0   :  { %vm10_vm0 = vcmask 64512   ;;  %s75_s0 = inlined_call_operand.vmem [shape: f32[16,8], index: 0, kind: input, shape index: {}]   ;;  %s76_s1 = inlined_call_operand.vmem [shape: f32[16,8], index: 1, kind: output, shape index: {}]  }
   0x1   :  { %v8_v0 = vld [vmem:[%s75_s0] sm:$0xff]  ;;  %v9_v1 = vld [vmem:[%s75_s0 + $0x8] sm:$0xff] }
   0x2   :  { %v11_v2 = vsel %vm10_vm0, %v8_v0, 0.0  ;;  %v12_v3 = vsel %vm10_vm0, %v9_v1, 0.0 }
   0x3   :  { %v13_v4 = vadd.f32 %v12_v3, %v11_v2 }
   0x5   :  { %v14_v5 = vrot.slane %v13_v4, 4 }
   0x7   :  { %v15_v6 = vadd.f32 %v14_v5, %v13_v4 }
   0x9   :  { %v16_v7 = vrot.slane %v15_v6, 2 }
   0xb   :  { %v17_v8 = vadd.f32 %v16_v7, %v15_v6 }
   0xd   :  { %v18_v9 = vrot.slane %v17_v8, 1 }
   0xf   :  { %v19_v10 = vadd.f32 %v18_v9, %v17_v8 }
  0x11   :  { %v20_v11 = vmul.f32 0.0625, %v19_v10 }
  0x13   :  { %v21_v12 = vsub.f32 %v8_v0, %v20_v11  ;;  %v22_v13 = vsub.f32 %v9_v1, %v20_v11 }
  0x15   :  { %v23_v14 = vmul.f32 %v21_v12, %v21_v12  ;;  %v24_v15 = vmul.f32 %v22_v13, %v22_v13 }
  0x17   :  { %v25_v16 = vsel %vm10_vm0, %v23_v14, 0.0  ;;  %v26_v17 = vsel %vm10_vm0, %v24_v15, 0.0 }
  0x18   :  { %v27_v18 = vadd.f32 %v26_v17, %v25_v16 }
  0x1a   :  { %v28_v19 = vrot.slane %v27_v18, 4 }
  0x1c   :  { %v29_v20 = vadd.f32 %v28_v19, %v27_v18 }
  0x1e   :  { %v30_v21 = vrot.slane %v29_v20, 2 }
  0x20   :  { %v31_v22 = vadd.f32 %v30_v21, %v29_v20 }
  0x22   :  { %v32_v23 = vrot.slane %v31_v22, 1 }
  0x24   :  { %v33_v24 = vadd.f32 %v32_v23, %v31_v22 }
  0x26   :  { %v34_v25 = vmul.f32 0.06666667, %v33_v24 }
  0x28   :  { %v35_v26 = vmax.f32 %v34_v25, 1e-12 }
  0x2a   :  { %45 = vrsqrt.f32 %v35_v26 }
  0x34   :  { %v46_v27 = vpop.eup %45 }
  0x35   :  { %v37_v28 = vmul.f32 %v46_v27, %v21_v12  ;;  %v38_v29 = vmul.f32 %v46_v27, %v22_v13 }
  0x37   :  { %39 = vst.msk [vmem:[%s76_s1] sm:$0xff] %vm10_vm0, %v37_v28  ;;  %40 = vst.msk [vmem:[%s76_s1 + $0x8] sm:$0xff] %vm10_vm0, %v38_v29 }

</bundles_post_ra>
